<compile_context>
chip_gen: v7x
topology: tpu7x:2x2x1
jax: 0.10.0
libtpu: 0.0.40
codegen_flags: <defaults>
</compile_context>

<pallas_src>
import functools

import jax
import jax.numpy as jnp
from jax import lax
from jax.experimental import pallas as pl
from jax.experimental.pallas import tpu as pltpu


def cross_attention_kernel(q_ref, k_ref, v_ref, gamma_ref, beta_ref,
                           wq_ref, wk_ref, wv_ref, wo_ref, out_ref,
                           qp_ref, kp_ref, vp_ref,
                           *, heads, dim_head, eps, mm_dtype):
    Bt, N, D = q_ref.shape
    inner = heads * dim_head

    gamma = gamma_ref[0][None, :].astype(jnp.float32)       # (1, D)
    beta = beta_ref[0][None, :].astype(jnp.float32)         # (1, D)

    def layernorm(x):                                        # (rows, D), f32 stats
        x = x.astype(jnp.float32)
        mu = jnp.mean(x, axis=-1, keepdims=True)
        var = jnp.mean(jnp.square(x - mu), axis=-1, keepdims=True)
        return (x - mu) * lax.rsqrt(var + eps) * gamma + beta

    # LayerNorm over the whole packed (Bt*N, D) slab, then one MXU matmul per
    # projection.  The softmax scale is already folded into wq (wrapper side).
    qn = layernorm(q_ref[...].reshape(Bt * N, D)).astype(mm_dtype)
    kn = layernorm(k_ref[...].reshape(Bt * N, D)).astype(mm_dtype)
    vn = layernorm(v_ref[...].reshape(Bt * N, D)).astype(mm_dtype)

    qp_ref[...] = jnp.dot(qn, wq_ref[...], preferred_element_type=jnp.float32
                          ).astype(mm_dtype).reshape(Bt, N, inner)
    kp_ref[...] = jnp.dot(kn, wk_ref[...], preferred_element_type=jnp.float32
                          ).astype(mm_dtype).reshape(Bt, N, inner)
    vp_ref[...] = jnp.dot(vn, wv_ref[...], preferred_element_type=jnp.float32
                          ).astype(mm_dtype).reshape(Bt, N, inner)

    wo = wo_ref[...]                                         # (inner, D) mm_dtype

    # Attention: fori_loop over packed batch elements so only one element's
    # intermediates are live at a time; heads is a small static constant so its
    # loop stays unrolled (static lane offsets).  Each head's context goes
    # straight through its W_out slice into a lane-dense (N, D) f32 accumulator.
    def batch_body(b, carry):
        qb = qp_ref[b]                                       # (N, inner)
        kb = kp_ref[b]
        vb = vp_ref[b]
        acc = jnp.zeros((N, D), jnp.float32)
        for h in range(heads):
            c0 = h * dim_head
            qh = qb[:, c0:c0 + dim_head]                     # (N, dh)
            kh = kb[:, c0:c0 + dim_head]
            vh = vb[:, c0:c0 + dim_head]
            # scores: contract trailing dims of Q and K (no transpose)
            dots = lax.dot_general(qh, kh, (((1,), (1,)), ((), ())),
                                   preferred_element_type=jnp.float32)  # (N, N)
            m = jnp.max(dots, axis=-1, keepdims=True)
            e = jnp.exp(dots - m)
            p = (e * pl.reciprocal(jnp.sum(e, axis=-1, keepdims=True),
                                   approx=True)).astype(mm_dtype)
            ctx = jnp.dot(p, vh, preferred_element_type=jnp.float32)    # (N, dh)
            acc = acc + jnp.dot(ctx.astype(mm_dtype), wo[c0:c0 + dim_head, :],
                                preferred_element_type=jnp.float32)     # (N, D)
        out_ref[b] = acc.astype(out_ref.dtype)
        return carry

    lax.fori_loop(0, Bt, batch_body, 0)


def _pick_block_b(B, N, D, inner, in_itemsize, mm_itemsize, vmem_limit_bytes):
    """Largest divisor of B whose grid-step footprint fits the VMEM budget,
    targeting ~512 packed rows per step and keeping >= 2 grid steps."""
    per_b = N * (4 * 2 * D * in_itemsize        # q/k/v/out tiles, double-buffered
                 + 3 * inner * mm_itemsize      # qp/kp/vp projection scratch
                 + 3 * (D + inner) * 4          # f32 LN / projection temporaries
                 + D * 4)                       # per-element output accumulator
    fixed = (3 * D * inner + inner * D + 2 * D) * mm_itemsize * 2
    budget = max(int(0.6 * vmem_limit_bytes) - fixed, per_b)
    max_rows = 512                              # enough rows to feed the MXU

    block_b = 1
    for cand in range(2, B + 1):
        if B % cand:
            continue
        if cand * N > max_rows or cand * per_b > budget:
            break
        block_b = cand
    # Keep >= 2 grid steps when possible: on v7x the "parallel" batch axis is
    # how work gets sharded across the 2 TensorCores (v5e/v6e lose ~nothing).
    if block_b == B and B >= 2:
        block_b = max(c for c in range(1, B) if B % c == 0)
    return block_b


def _const_spec(shape):
    """Spec for operands that never change across the grid: single-buffer them
    when the installed JAX supports pipeline_mode (saves VMEM, esp. on v7x)."""
    index_map = lambda b: (0,) * len(shape)
    try:
        return pl.BlockSpec(shape, index_map, pipeline_mode=pl.Buffered(1))
    except Exception:
        return pl.BlockSpec(shape, index_map)


def cross_attention(q, k, v, gamma, beta, wq_t, wk_t, wv_t, wo_t, *,
                    heads, dim_head, mm_dtype=jnp.bfloat16,
                    block_b=None, vmem_limit_bytes=None):
    """q, k, v: (B, N, D).  gamma/beta: (1, D).  Weights pre-transposed to
    (in_features, out_features): wq_t/wk_t/wv_t: (D, inner), wo_t: (inner, D)."""
    B, N, D = q.shape
    inner = heads * dim_head
    assert wq_t.shape == (D, inner) and wo_t.shape == (inner, D)
    scale = dim_head ** (-0.5)

    # Generation-aware VMEM budget (v7x: 64 MiB/TC, v5e/v6e: 128 MiB).
    if vmem_limit_bytes is None:
        try:
            cap = int(pltpu.get_tpu_info().vmem_capacity_bytes)
        except Exception:
            cap = 128 * 1024 * 1024
        vmem_limit_bytes = min(int(0.75 * cap), 96 * 1024 * 1024)

    if block_b is None:
        block_b = _pick_block_b(B, N, D, inner,
                                jnp.dtype(q.dtype).itemsize,
                                jnp.dtype(mm_dtype).itemsize,
                                vmem_limit_bytes)
    assert B % block_b == 0

    # One-time host-side weight prep: cast to the MXU dtype (halves weight DMA
    # for bf16) and fold the softmax scale into W_q.
    wq_c = (wq_t * scale).astype(mm_dtype)
    wk_c = wk_t.astype(mm_dtype)
    wv_c = wv_t.astype(mm_dtype)
    wo_c = wo_t.astype(mm_dtype)

    kern = functools.partial(cross_attention_kernel, heads=heads,
                             dim_head=dim_head, eps=1e-5, mm_dtype=mm_dtype)

    seq_spec = pl.BlockSpec((block_b, N, D), lambda b: (b, 0, 0))

    return pl.pallas_call(
        kern,
        out_shape=jax.ShapeDtypeStruct((B, N, D), q.dtype),
        grid=(B // block_b,),
        in_specs=[seq_spec, seq_spec, seq_spec,
                  _const_spec((1, D)), _const_spec((1, D)),
                  _const_spec((D, inner)), _const_spec((D, inner)),
                  _const_spec((D, inner)), _const_spec((inner, D))],
        out_specs=seq_spec,
        scratch_shapes=[pltpu.VMEM((block_b, N, inner), mm_dtype),
                        pltpu.VMEM((block_b, N, inner), mm_dtype),
                        pltpu.VMEM((block_b, N, inner), mm_dtype)],
        compiler_params=pltpu.CompilerParams(
            dimension_semantics=("parallel",),
            vmem_limit_bytes=int(vmem_limit_bytes)),
    )(q, k, v, gamma, beta, wq_c, wk_c, wv_c, wo_c)


def reference(q, k, v, gamma, beta, wq_t, wk_t, wv_t, wo_t, *, heads, dim_head):
    def ln(x):
        mu = jnp.mean(x, axis=-1, keepdims=True)
        var = jnp.mean(jnp.square(x - mu), axis=-1, keepdims=True)
        return (x - mu) / jnp.sqrt(var + 1e-5) * gamma + beta

    B, N, D = q.shape
    qn, kn, vn = ln(q), ln(k), ln(v)
    qp, kp, vp = qn @ wq_t, kn @ wk_t, vn @ wv_t            # (B, N, inner)

    def split(t):  # b n (h d) -> b h n d
        return t.reshape(B, N, heads, dim_head).transpose(0, 2, 1, 3)

    qh, kh, vh = split(qp), split(kp), split(vp)
    dots = jnp.einsum('bhnd,bhmd->bhnm', qh, kh) * (dim_head ** -0.5)
    attn = jax.nn.softmax(dots, axis=-1)
    out = jnp.einsum('bhnm,bhmd->bhnd', attn, vh)
    out = out.transpose(0, 2, 1, 3).reshape(B, N, heads * dim_head)
    return out @ wo_t


if __name__ == "__main__":
    B, N, D = 2, 8, 32
    heads, dim_head = 2, 16
    inner = heads * dim_head

    key = jax.random.PRNGKey(0)
    kq, kk, kv, kwq, kwk, kwv, kwo, kg, kb = jax.random.split(key, 9)

    q = jax.random.normal(kq, (B, N, D), dtype=jnp.float32)
    k = jax.random.normal(kk, (B, N, D), dtype=jnp.float32)
    v = jax.random.normal(kv, (B, N, D), dtype=jnp.float32)

    # LayerNorm affine params, stored as (1, D); mildly perturbed from default.
    gamma = (jnp.ones((1, D), jnp.float32)
             + 0.1 * jax.random.normal(kg, (1, D), jnp.float32))
    beta = 0.1 * jax.random.normal(kb, (1, D), jnp.float32)

    # Linear weights (no bias), pre-transposed to (in, out).
    wq_t = jax.random.normal(kwq, (D, inner), dtype=jnp.float32) * 0.05
    wk_t = jax.random.normal(kwk, (D, inner), dtype=jnp.float32) * 0.05
    wv_t = jax.random.normal(kwv, (D, inner), dtype=jnp.float32) * 0.05
    wo_t = jax.random.normal(kwo, (inner, D), dtype=jnp.float32) * 0.05

    ref = reference(q, k, v, gamma[0], beta[0], wq_t, wk_t, wv_t, wo_t,
                    heads=heads, dim_head=dim_head)

    # f32 MXU operands (validation path).
    out_f32 = cross_attention(q, k, v, gamma, beta, wq_t, wk_t, wv_t, wo_t,
                              heads=heads, dim_head=dim_head,
                              mm_dtype=jnp.float32)
    out_f32 = jax.block_until_ready(out_f32)
    assert jnp.allclose(out_f32, ref, atol=5e-3, rtol=5e-3), "f32 path mismatch"

    # bf16 MXU operands with f32 accumulation (production default).
    out_bf16 = cross_attention(q, k, v, gamma, beta, wq_t, wk_t, wv_t, wo_t,
                               heads=heads, dim_head=dim_head,
                               mm_dtype=jnp.bfloat16)
    out_bf16 = jax.block_until_ready(out_bf16)
    assert jnp.allclose(out_bf16, ref, atol=3e-2, rtol=3e-2), "bf16 path mismatch"

    print("KERNEL_OK")
</pallas_src>

<mosaic_0001>
module attributes {stable_mosaic.version = 11 : i64} {
  func.func @cross_attention_kernel(%arg0: i32, %arg1: memref<1x8x32xf32, #tpu.memory_space<vmem>>, %arg2: memref<1x8x32xf32, #tpu.memory_space<vmem>>, %arg3: memref<1x8x32xf32, #tpu.memory_space<vmem>>, %arg4: memref<1x32xf32, #tpu.memory_space<vmem>>, %arg5: memref<1x32xf32, #tpu.memory_space<vmem>>, %arg6: memref<32x32xf32, #tpu.memory_space<vmem>>, %arg7: memref<32x32xf32, #tpu.memory_space<vmem>>, %arg8: memref<32x32xf32, #tpu.memory_space<vmem>>, %arg9: memref<32x32xf32, #tpu.memory_space<vmem>>, %arg10: memref<1x8x32xf32, #tpu.memory_space<vmem>>, %arg11: memref<1x8x32xf32, #tpu.memory_space<vmem>>, %arg12: memref<1x8x32xf32, #tpu.memory_space<vmem>>, %arg13: memref<1x8x32xf32, #tpu.memory_space<vmem>>) attributes {dimension_semantics = [#tpu.dimension_semantics<parallel>], iteration_bounds = array<i64: 2>, scalar_prefetch = 0 : i64, scratch_operands = 3 : i64, tpu.core_type = #tpu.core_type<tc>, window_params = [{transform_indices = @transform_0, window_bounds = array<i64: 1, 8, 32>}, {transform_indices = @transform_1, window_bounds = array<i64: 1, 8, 32>}, {transform_indices = @transform_2, window_bounds = array<i64: 1, 8, 32>}, {pipeline_mode = #tpu.pipeline_mode<synchronous>, transform_indices = @transform_3, window_bounds = array<i64: 1, 32>}, {pipeline_mode = #tpu.pipeline_mode<synchronous>, transform_indices = @transform_4, window_bounds = array<i64: 1, 32>}, {pipeline_mode = #tpu.pipeline_mode<synchronous>, transform_indices = @transform_5, window_bounds = array<i64: 32, 32>}, {pipeline_mode = #tpu.pipeline_mode<synchronous>, transform_indices = @transform_6, window_bounds = array<i64: 32, 32>}, {pipeline_mode = #tpu.pipeline_mode<synchronous>, transform_indices = @transform_7, window_bounds = array<i64: 32, 32>}, {pipeline_mode = #tpu.pipeline_mode<synchronous>, transform_indices = @transform_8, window_bounds = array<i64: 32, 32>}, {transform_indices = @transform_9, window_bounds = array<i64: 1, 8, 32>}]} {
    %c0 = arith.constant 0 : index
    %c0_0 = arith.constant 0 : index
    %0 = vector.load %arg4[%c0, %c0_0] : memref<1x32xf32, #tpu.memory_space<vmem>>, vector<1x32xf32>
    %1 = vector.shape_cast %0 : vector<1x32xf32> to vector<32xf32>
    %2 = vector.shape_cast %1 : vector<32xf32> to vector<1x32xf32>
    %c0_1 = arith.constant 0 : index
    %c0_2 = arith.constant 0 : index
    %3 = vector.load %arg5[%c0_1, %c0_2] : memref<1x32xf32, #tpu.memory_space<vmem>>, vector<1x32xf32>
    %4 = vector.shape_cast %3 : vector<1x32xf32> to vector<32xf32>
    %5 = vector.shape_cast %4 : vector<32xf32> to vector<1x32xf32>
    %c0_3 = arith.constant 0 : index
    %c0_4 = arith.constant 0 : index
    %c0_5 = arith.constant 0 : index
    %6 = vector.load %arg1[%c0_3, %c0_4, %c0_5] : memref<1x8x32xf32, #tpu.memory_space<vmem>>, vector<1x8x32xf32>
    %7 = vector.shape_cast %6 : vector<1x8x32xf32> to vector<8x32xf32>
    %cst = arith.constant dense<0.000000e+00> : vector<8xf32>
    %8 = vector.multi_reduction <add>, %7, %cst [1] : vector<8x32xf32> to vector<8xf32>
    %9 = vector.shape_cast %8 : vector<8xf32> to vector<8x1xf32>
    %cst_6 = arith.constant 3.200000e+01 : f32
    %10 = vector.broadcast %cst_6 : f32 to vector<8x1xf32>
    %11 = arith.divf %9, %10 : vector<8x1xf32>
    %12 = vector.broadcast %11 : vector<8x1xf32> to vector<8x32xf32>
    %13 = arith.subf %7, %12 : vector<8x32xf32>
    %14 = arith.mulf %13, %13 : vector<8x32xf32>
    %cst_7 = arith.constant dense<0.000000e+00> : vector<8xf32>
    %15 = vector.multi_reduction <add>, %14, %cst_7 [1] : vector<8x32xf32> to vector<8xf32>
    %16 = vector.shape_cast %15 : vector<8xf32> to vector<8x1xf32>
    %cst_8 = arith.constant 3.200000e+01 : f32
    %17 = vector.broadcast %cst_8 : f32 to vector<8x1xf32>
    %18 = arith.divf %16, %17 : vector<8x1xf32>
    %19 = vector.broadcast %11 : vector<8x1xf32> to vector<8x32xf32>
    %20 = arith.subf %7, %19 : vector<8x32xf32>
    %cst_9 = arith.constant 9.99999974E-6 : f32
    %21 = vector.broadcast %cst_9 : f32 to vector<8x1xf32>
    %22 = arith.addf %18, %21 : vector<8x1xf32>
    %23 = math.rsqrt %22 : vector<8x1xf32>
    %24 = vector.broadcast %23 : vector<8x1xf32> to vector<8x32xf32>
    %25 = arith.mulf %20, %24 : vector<8x32xf32>
    %26 = vector.broadcast %2 : vector<1x32xf32> to vector<8x32xf32>
    %27 = arith.mulf %25, %26 : vector<8x32xf32>
    %28 = vector.broadcast %5 : vector<1x32xf32> to vector<8x32xf32>
    %29 = arith.addf %27, %28 : vector<8x32xf32>
    %c0_10 = arith.constant 0 : index
    %c0_11 = arith.constant 0 : index
    %c0_12 = arith.constant 0 : index
    %30 = vector.load %arg2[%c0_10, %c0_11, %c0_12] : memref<1x8x32xf32, #tpu.memory_space<vmem>>, vector<1x8x32xf32>
    %31 = vector.shape_cast %30 : vector<1x8x32xf32> to vector<8x32xf32>
    %cst_13 = arith.constant dense<0.000000e+00> : vector<8xf32>
    %32 = vector.multi_reduction <add>, %31, %cst_13 [1] : vector<8x32xf32> to vector<8xf32>
    %33 = vector.shape_cast %32 : vector<8xf32> to vector<8x1xf32>
    %cst_14 = arith.constant 3.200000e+01 : f32
    %34 = vector.broadcast %cst_14 : f32 to vector<8x1xf32>
    %35 = arith.divf %33, %34 : vector<8x1xf32>
    %36 = vector.broadcast %35 : vector<8x1xf32> to vector<8x32xf32>
    %37 = arith.subf %31, %36 : vector<8x32xf32>
    %38 = arith.mulf %37, %37 : vector<8x32xf32>
    %cst_15 = arith.constant dense<0.000000e+00> : vector<8xf32>
    %39 = vector.multi_reduction <add>, %38, %cst_15 [1] : vector<8x32xf32> to vector<8xf32>
    %40 = vector.shape_cast %39 : vector<8xf32> to vector<8x1xf32>
    %cst_16 = arith.constant 3.200000e+01 : f32
    %41 = vector.broadcast %cst_16 : f32 to vector<8x1xf32>
    %42 = arith.divf %40, %41 : vector<8x1xf32>
    %43 = vector.broadcast %35 : vector<8x1xf32> to vector<8x32xf32>
    %44 = arith.subf %31, %43 : vector<8x32xf32>
    %cst_17 = arith.constant 9.99999974E-6 : f32
    %45 = vector.broadcast %cst_17 : f32 to vector<8x1xf32>
    %46 = arith.addf %42, %45 : vector<8x1xf32>
    %47 = math.rsqrt %46 : vector<8x1xf32>
    %48 = vector.broadcast %47 : vector<8x1xf32> to vector<8x32xf32>
    %49 = arith.mulf %44, %48 : vector<8x32xf32>
    %50 = vector.broadcast %2 : vector<1x32xf32> to vector<8x32xf32>
    %51 = arith.mulf %49, %50 : vector<8x32xf32>
    %52 = vector.broadcast %5 : vector<1x32xf32> to vector<8x32xf32>
    %53 = arith.addf %51, %52 : vector<8x32xf32>
    %c0_18 = arith.constant 0 : index
    %c0_19 = arith.constant 0 : index
    %c0_20 = arith.constant 0 : index
    %54 = vector.load %arg3[%c0_18, %c0_19, %c0_20] : memref<1x8x32xf32, #tpu.memory_space<vmem>>, vector<1x8x32xf32>
    %55 = vector.shape_cast %54 : vector<1x8x32xf32> to vector<8x32xf32>
    %cst_21 = arith.constant dense<0.000000e+00> : vector<8xf32>
    %56 = vector.multi_reduction <add>, %55, %cst_21 [1] : vector<8x32xf32> to vector<8xf32>
    %57 = vector.shape_cast %56 : vector<8xf32> to vector<8x1xf32>
    %cst_22 = arith.constant 3.200000e+01 : f32
    %58 = vector.broadcast %cst_22 : f32 to vector<8x1xf32>
    %59 = arith.divf %57, %58 : vector<8x1xf32>
    %60 = vector.broadcast %59 : vector<8x1xf32> to vector<8x32xf32>
    %61 = arith.subf %55, %60 : vector<8x32xf32>
    %62 = arith.mulf %61, %61 : vector<8x32xf32>
    %cst_23 = arith.constant dense<0.000000e+00> : vector<8xf32>
    %63 = vector.multi_reduction <add>, %62, %cst_23 [1] : vector<8x32xf32> to vector<8xf32>
    %64 = vector.shape_cast %63 : vector<8xf32> to vector<8x1xf32>
    %cst_24 = arith.constant 3.200000e+01 : f32
    %65 = vector.broadcast %cst_24 : f32 to vector<8x1xf32>
    %66 = arith.divf %64, %65 : vector<8x1xf32>
    %67 = vector.broadcast %59 : vector<8x1xf32> to vector<8x32xf32>
    %68 = arith.subf %55, %67 : vector<8x32xf32>
    %cst_25 = arith.constant 9.99999974E-6 : f32
    %69 = vector.broadcast %cst_25 : f32 to vector<8x1xf32>
    %70 = arith.addf %66, %69 : vector<8x1xf32>
    %71 = math.rsqrt %70 : vector<8x1xf32>
    %72 = vector.broadcast %71 : vector<8x1xf32> to vector<8x32xf32>
    %73 = arith.mulf %68, %72 : vector<8x32xf32>
    %74 = vector.broadcast %2 : vector<1x32xf32> to vector<8x32xf32>
    %75 = arith.mulf %73, %74 : vector<8x32xf32>
    %76 = vector.broadcast %5 : vector<1x32xf32> to vector<8x32xf32>
    %77 = arith.addf %75, %76 : vector<8x32xf32>
    %c0_26 = arith.constant 0 : index
    %c0_27 = arith.constant 0 : index
    %78 = vector.load %arg6[%c0_26, %c0_27] : memref<32x32xf32, #tpu.memory_space<vmem>>, vector<32x32xf32>
    %cst_28 = arith.constant dense<0.000000e+00> : vector<8x32xf32>
    %79 = tpu.matmul %29, %78, %cst_28 {dimension_numbers = #tpu.dot_dimension_numbers<[1], [0], [0], [1], [0, 0, 1, 1], [], []>} : vector<8x32xf32>, vector<32x32xf32>, vector<8x32xf32> -> vector<8x32xf32>
    %80 = vector.shape_cast %79 : vector<8x32xf32> to vector<1x8x32xf32>
    %c0_29 = arith.constant 0 : index
    %c0_30 = arith.constant 0 : index
    %c0_31 = arith.constant 0 : index
    %81 = vector.load %arg11[%c0_29, %c0_30, %c0_31] : memref<1x8x32xf32, #tpu.memory_space<vmem>>, vector<1x8x32xf32>
    tpu.vector_store %arg11[%c0_29, %c0_30, %c0_31], %80 {strides = array<i32>} : memref<1x8x32xf32, #tpu.memory_space<vmem>>, vector<1x8x32xf32>,
    %c0_32 = arith.constant 0 : index
    %c0_33 = arith.constant 0 : index
    %82 = vector.load %arg7[%c0_32, %c0_33] : memref<32x32xf32, #tpu.memory_space<vmem>>, vector<32x32xf32>
    %cst_34 = arith.constant dense<0.000000e+00> : vector<8x32xf32>
    %83 = tpu.matmul %53, %82, %cst_34 {dimension_numbers = #tpu.dot_dimension_numbers<[1], [0], [0], [1], [0, 0, 1, 1], [], []>} : vector<8x32xf32>, vector<32x32xf32>, vector<8x32xf32> -> vector<8x32xf32>
    %84 = vector.shape_cast %83 : vector<8x32xf32> to vector<1x8x32xf32>
    %c0_35 = arith.constant 0 : index
    %c0_36 = arith.constant 0 : index
    %c0_37 = arith.constant 0 : index
    %85 = vector.load %arg12[%c0_35, %c0_36, %c0_37] : memref<1x8x32xf32, #tpu.memory_space<vmem>>, vector<1x8x32xf32>
    tpu.vector_store %arg12[%c0_35, %c0_36, %c0_37], %84 {strides = array<i32>} : memref<1x8x32xf32, #tpu.memory_space<vmem>>, vector<1x8x32xf32>,
    %c0_38 = arith.constant 0 : index
    %c0_39 = arith.constant 0 : index
    %86 = vector.load %arg8[%c0_38, %c0_39] : memref<32x32xf32, #tpu.memory_space<vmem>>, vector<32x32xf32>
    %cst_40 = arith.constant dense<0.000000e+00> : vector<8x32xf32>
    %87 = tpu.matmul %77, %86, %cst_40 {dimension_numbers = #tpu.dot_dimension_numbers<[1], [0], [0], [1], [0, 0, 1, 1], [], []>} : vector<8x32xf32>, vector<32x32xf32>, vector<8x32xf32> -> vector<8x32xf32>
    %88 = vector.shape_cast %87 : vector<8x32xf32> to vector<1x8x32xf32>
    %c0_41 = arith.constant 0 : index
    %c0_42 = arith.constant 0 : index
    %c0_43 = arith.constant 0 : index
    %89 = vector.load %arg13[%c0_41, %c0_42, %c0_43] : memref<1x8x32xf32, #tpu.memory_space<vmem>>, vector<1x8x32xf32>
    tpu.vector_store %arg13[%c0_41, %c0_42, %c0_43], %88 {strides = array<i32>} : memref<1x8x32xf32, #tpu.memory_space<vmem>>, vector<1x8x32xf32>,
    %c0_44 = arith.constant 0 : index
    %c0_45 = arith.constant 0 : index
    %90 = vector.load %arg9[%c0_44, %c0_45] : memref<32x32xf32, #tpu.memory_space<vmem>>, vector<32x32xf32>
    %c0_i32 = arith.constant 0 : i32
    %91 = arith.index_cast %c0_i32 : i32 to index
    %c0_46 = arith.constant 0 : index
    %c0_47 = arith.constant 0 : index
    %92 = vector.load %arg11[%91, %c0_46, %c0_47] : memref<1x8x32xf32, #tpu.memory_space<vmem>>, vector<1x8x32xf32>
    %93 = vector.shape_cast %92 : vector<1x8x32xf32> to vector<8x32xf32>
    %94 = arith.index_cast %c0_i32 : i32 to index
    %c0_48 = arith.constant 0 : index
    %c0_49 = arith.constant 0 : index
    %95 = vector.load %arg12[%94, %c0_48, %c0_49] : memref<1x8x32xf32, #tpu.memory_space<vmem>>, vector<1x8x32xf32>
    %96 = vector.shape_cast %95 : vector<1x8x32xf32> to vector<8x32xf32>
    %97 = arith.index_cast %c0_i32 : i32 to index
    %c0_50 = arith.constant 0 : index
    %c0_51 = arith.constant 0 : index
    %98 = vector.load %arg13[%97, %c0_50, %c0_51] : memref<1x8x32xf32, #tpu.memory_space<vmem>>, vector<1x8x32xf32>
    %99 = vector.shape_cast %98 : vector<1x8x32xf32> to vector<8x32xf32>
    %cst_52 = arith.constant 0.000000e+00 : f32
    %100 = vector.broadcast %cst_52 : f32 to vector<8x32xf32>
    %101 = vector.extract_strided_slice %93 {offsets = [0, 0], sizes = [8, 16], strides = [1, 1]} : vector<8x32xf32> to vector<8x16xf32>
    %102 = vector.extract_strided_slice %96 {offsets = [0, 0], sizes = [8, 16], strides = [1, 1]} : vector<8x32xf32> to vector<8x16xf32>
    %103 = vector.extract_strided_slice %99 {offsets = [0, 0], sizes = [8, 16], strides = [1, 1]} : vector<8x32xf32> to vector<8x16xf32>
    %cst_53 = arith.constant dense<0.000000e+00> : vector<8x8xf32>
    %104 = tpu.matmul %101, %102, %cst_53 {dimension_numbers = #tpu.dot_dimension_numbers<[1], [1], [0], [0], [0, 0, 1, 0], [], []>} : vector<8x16xf32>, vector<8x16xf32>, vector<8x8xf32> -> vector<8x8xf32>
    %cst_54 = arith.constant dense<0xFF800000> : vector<8xf32>
    %105 = vector.multi_reduction <maximumf>, %104, %cst_54 [1] : vector<8x8xf32> to vector<8xf32>
    %106 = vector.shape_cast %105 : vector<8xf32> to vector<8x1xf32>
    %107 = vector.broadcast %106 : vector<8x1xf32> to vector<8x8xf32>
    %108 = arith.subf %104, %107 : vector<8x8xf32>
    %109 = math.exp %108 : vector<8x8xf32>
    %cst_55 = arith.constant dense<0.000000e+00> : vector<8xf32>
    %110 = vector.multi_reduction <add>, %109, %cst_55 [1] : vector<8x8xf32> to vector<8xf32>
    %111 = vector.shape_cast %110 : vector<8xf32> to vector<8x1xf32>
    %112 = tpu.reciprocal %111 {approx = true} : vector<8x1xf32> -> vector<8x1xf32>
    %113 = vector.broadcast %112 : vector<8x1xf32> to vector<8x8xf32>
    %114 = arith.mulf %109, %113 : vector<8x8xf32>
    %cst_56 = arith.constant dense<0.000000e+00> : vector<8x16xf32>
    %115 = tpu.matmul %114, %103, %cst_56 {dimension_numbers = #tpu.dot_dimension_numbers<[1], [0], [0], [1], [0, 0, 1, 1], [], []>} : vector<8x8xf32>, vector<8x16xf32>, vector<8x16xf32> -> vector<8x16xf32>
    %116 = vector.extract_strided_slice %90 {offsets = [0, 0], sizes = [16, 32], strides = [1, 1]} : vector<32x32xf32> to vector<16x32xf32>
    %cst_57 = arith.constant dense<0.000000e+00> : vector<8x32xf32>
    %117 = tpu.matmul %115, %116, %cst_57 {dimension_numbers = #tpu.dot_dimension_numbers<[1], [0], [0], [1], [0, 0, 1, 1], [], []>} : vector<8x16xf32>, vector<16x32xf32>, vector<8x32xf32> -> vector<8x32xf32>
    %118 = arith.addf %100, %117 : vector<8x32xf32>
    %119 = vector.extract_strided_slice %93 {offsets = [0, 16], sizes = [8, 16], strides = [1, 1]} : vector<8x32xf32> to vector<8x16xf32>
    %120 = vector.extract_strided_slice %96 {offsets = [0, 16], sizes = [8, 16], strides = [1, 1]} : vector<8x32xf32> to vector<8x16xf32>
    %121 = vector.extract_strided_slice %99 {offsets = [0, 16], sizes = [8, 16], strides = [1, 1]} : vector<8x32xf32> to vector<8x16xf32>
    %cst_58 = arith.constant dense<0.000000e+00> : vector<8x8xf32>
    %122 = tpu.matmul %119, %120, %cst_58 {dimension_numbers = #tpu.dot_dimension_numbers<[1], [1], [0], [0], [0, 0, 1, 0], [], []>} : vector<8x16xf32>, vector<8x16xf32>, vector<8x8xf32> -> vector<8x8xf32>
    %cst_59 = arith.constant dense<0xFF800000> : vector<8xf32>
    %123 = vector.multi_reduction <maximumf>, %122, %cst_59 [1] : vector<8x8xf32> to vector<8xf32>
    %124 = vector.shape_cast %123 : vector<8xf32> to vector<8x1xf32>
    %125 = vector.broadcast %124 : vector<8x1xf32> to vector<8x8xf32>
    %126 = arith.subf %122, %125 : vector<8x8xf32>
    %127 = math.exp %126 : vector<8x8xf32>
    %cst_60 = arith.constant dense<0.000000e+00> : vector<8xf32>
    %128 = vector.multi_reduction <add>, %127, %cst_60 [1] : vector<8x8xf32> to vector<8xf32>
    %129 = vector.shape_cast %128 : vector<8xf32> to vector<8x1xf32>
    %130 = tpu.reciprocal %129 {approx = true} : vector<8x1xf32> -> vector<8x1xf32>
    %131 = vector.broadcast %130 : vector<8x1xf32> to vector<8x8xf32>
    %132 = arith.mulf %127, %131 : vector<8x8xf32>
    %cst_61 = arith.constant dense<0.000000e+00> : vector<8x16xf32>
    %133 = tpu.matmul %132, %121, %cst_61 {dimension_numbers = #tpu.dot_dimension_numbers<[1], [0], [0], [1], [0, 0, 1, 1], [], []>} : vector<8x8xf32>, vector<8x16xf32>, vector<8x16xf32> -> vector<8x16xf32>
    %134 = vector.extract_strided_slice %90 {offsets = [16, 0], sizes = [16, 32], strides = [1, 1]} : vector<32x32xf32> to vector<16x32xf32>
    %cst_62 = arith.constant dense<0.000000e+00> : vector<8x32xf32>
    %135 = tpu.matmul %133, %134, %cst_62 {dimension_numbers = #tpu.dot_dimension_numbers<[1], [0], [0], [1], [0, 0, 1, 1], [], []>} : vector<8x16xf32>, vector<16x32xf32>, vector<8x32xf32> -> vector<8x32xf32>
    %136 = arith.addf %118, %135 : vector<8x32xf32>
    %137 = arith.index_cast %c0_i32 : i32 to index
    %c0_63 = arith.constant 0 : index
    %c0_64 = arith.constant 0 : index
    %138 = vector.load %arg10[%137, %c0_63, %c0_64] : memref<1x8x32xf32, #tpu.memory_space<vmem>>, vector<1x8x32xf32>
    %139 = vector.shape_cast %138 : vector<1x8x32xf32> to vector<8x32xf32>
    %140 = vector.shape_cast %136 : vector<8x32xf32> to vector<1x8x32xf32>
    tpu.vector_store %arg10[%137, %c0_63, %c0_64], %140 {strides = array<i32>} : memref<1x8x32xf32, #tpu.memory_space<vmem>>, vector<1x8x32xf32>,
    %c1_i32 = arith.constant 1 : i32
    return
  }
  func.func @transform_0(%arg0: i32) -> (i32, i32, i32) {
    %c0_i32 = arith.constant 0 : i32
    %c0_i32_0 = arith.constant 0 : i32
    %c0_i32_1 = arith.constant 0 : i32
    return %arg0, %c0_i32, %c0_i32_0 : i32, i32, i32
  }
  func.func @transform_1(%arg0: i32) -> (i32, i32, i32) {
    %c0_i32 = arith.constant 0 : i32
    %c0_i32_0 = arith.constant 0 : i32
    %c0_i32_1 = arith.constant 0 : i32
    return %arg0, %c0_i32, %c0_i32_0 : i32, i32, i32
  }
  func.func @transform_2(%arg0: i32) -> (i32, i32, i32) {
    %c0_i32 = arith.constant 0 : i32
    %c0_i32_0 = arith.constant 0 : i32
    %c0_i32_1 = arith.constant 0 : i32
    return %arg0, %c0_i32, %c0_i32_0 : i32, i32, i32
  }
  func.func @transform_3(%arg0: i32) -> (i32, i32) {
    %c0_i32 = arith.constant 0 : i32
    %c0_i32_0 = arith.constant 0 : i32
    %c0_i32_1 = arith.constant 0 : i32
    return %c0_i32, %c0_i32_0 : i32, i32
  }
  func.func @transform_4(%arg0: i32) -> (i32, i32) {
    %c0_i32 = arith.constant 0 : i32
    %c0_i32_0 = arith.constant 0 : i32
    %c0_i32_1 = arith.constant 0 : i32
    return %c0_i32, %c0_i32_0 : i32, i32
  }
  func.func @transform_5(%arg0: i32) -> (i32, i32) {
    %c0_i32 = arith.constant 0 : i32
    %c0_i32_0 = arith.constant 0 : i32
    %c0_i32_1 = arith.constant 0 : i32
    return %c0_i32, %c0_i32_0 : i32, i32
  }
  func.func @transform_6(%arg0: i32) -> (i32, i32) {
    %c0_i32 = arith.constant 0 : i32
    %c0_i32_0 = arith.constant 0 : i32
    %c0_i32_1 = arith.constant 0 : i32
    return %c0_i32, %c0_i32_0 : i32, i32
  }
  func.func @transform_7(%arg0: i32) -> (i32, i32) {
    %c0_i32 = arith.constant 0 : i32
    %c0_i32_0 = arith.constant 0 : i32
    %c0_i32_1 = arith.constant 0 : i32
    return %c0_i32, %c0_i32_0 : i32, i32
  }
  func.func @transform_8(%arg0: i32) -> (i32, i32) {
    %c0_i32 = arith.constant 0 : i32
    %c0_i32_0 = arith.constant 0 : i32
    %c0_i32_1 = arith.constant 0 : i32
    return %c0_i32, %c0_i32_0 : i32, i32
  }
  func.func @transform_9(%arg0: i32) -> (i32, i32, i32) {
    %c0_i32 = arith.constant 0 : i32
    %c0_i32_0 = arith.constant 0 : i32
    %c0_i32_1 = arith.constant 0 : i32
    return %arg0, %c0_i32, %c0_i32_0 : i32, i32, i32
  }
}

</mosaic_0001>

<bundles_post_ra>
// kernel: tpu_custom_call.1
= control target key start
LH: loop header
LB: loop body
LE: loop exit
PB: predicated region body
PF: predicated region fallthrough
CT: control target
= control target key end

     0   :  { %s2639_s0 = inlined_call_operand.hbm [shape: f32[2,8,32], index: 0, kind: input, shape index: {}]   ;;  %s2640_s1 = inlined_call_operand.hbm [shape: f32[2,8,32], index: 1, kind: input, shape index: {}]   ;;  %s2641_s2 = inlined_call_operand.hbm [shape: f32[2,8,32], index: 2, kind: input, shape index: {}]   ;;  %s2642_s3 = inlined_call_operand.hbm [shape: f32[1,32], index: 3, kind: input, shape index: {}]   ;;  %s2643_s4 = inlined_call_operand.hbm [shape: f32[1,32], index: 4, kind: input, shape index: {}]   ;;  %s2644_s5 = inlined_call_operand.hbm [shape: f32[32,32], index: 5, kind: input, shape index: {}]   ;;  %s2645_s6 = inlined_call_operand.hbm [shape: f32[32,32], index: 6, kind: input, shape index: {}]   ;;  %s2646_s7 = inlined_call_operand.hbm [shape: f32[32,32], index: 7, kind: input, shape index: {}]   ;;  %s2647_s8 = inlined_call_operand.hbm [shape: f32[32,32], index: 8, kind: input, shape index: {}]   ;;  %s2648_s9 = inlined_call_operand.hbm [shape: f32[2,8,32], index: 9, kind: output, shape index: {}]  }
   0x1   :  { %2672 = sst [smem:[#allocation32_spill]] %s2640_s1 }
   0x2   :  { %2673 = sst [smem:[#allocation33_spill]] %s2642_s3 }
   0x3   :  { %2674 = sst [smem:[#allocation34_spill]] %s2643_s4 }
   0x4   :  { %2675 = sst [smem:[#allocation35_spill]] %s2644_s5 }
   0x5   :  { %2676 = sst [smem:[#allocation36_spill]] %s2646_s7 }
   0x6   :  { %2677 = sst [smem:[#allocation37_spill]] %s2648_s9 }
   0x7   :  { %14 = vsyncpa [#allocation6], 0 }
   0x8   :  { %16 = vsyncpa [#allocation6 + $0x1], 0 }
   0x9   :  { %17 = vsyncpa [#allocation9], 0 }
   0xa   :  { %19 = vsyncpa [#allocation9 + $0x1], 0 }
   0xb   :  { %20 = vsyncpa [#allocation12], 0 }
   0xc   :  { %21 = vsyncpa [#allocation15], 0 }
   0xd   :  { %22 = vsyncpa [#allocation18], 0 }
   0xe   :  { %23 = vsyncpa [#allocation7], 0 }
   0xf   :  { %25 = vsyncpa [#allocation7 + $0x1], 0  ;;  %s2176_s30 = smov 0   ;;  %s2178_s10 = smov 0  }
  0x10   :  { %s2180_s11 = smov 0   ;;  %s2182_s12 = smov 0  }
  0x11 LB: > { %2678 = sst [smem:[#allocation27_spill]] %s2096_s30  ;;  %s2110_s13 = smov [#allocation11]   ;;  %s2108_s12 = sphi %s2182_s12, %s2720_s12   ;;  %s2104_s11 = sphi %s2180_s11, %s2724_s11   ;;  %s2100_s10 = sphi %s2178_s10, %s2723_s10   ;;  %s2096_s30 = sphi %s2176_s30, %s2722_s30  }
  0x12   : > { %2679 = sst [smem:[#allocation28_spill]] %s2108_s12  ;;  %s279_s14 = sshll.u32 %s2110_s13, 4  ;;  %s2202_s14 = int_to_ptr.vmem [resolvable:$true] %s279_s14 }
  0x13   : > { %s2197_s15 = sadd.s32 4294967295, %s2108_s12   ;;  %p1467_p0 = scmp.ge.s32.totalorder %s2108_s12, 1 }
  0x14   : > { %p2658_p1 = scmp.eq.s32.totalorder %s2197_s15, 0  ;;  %p266_p2 = scmp.lt.s32.totalorder %s2108_s12, 3 }
  0x15   : > { %s2111_s17 = smov [#allocation14]   ;;  %s2112_s20 = smov [#allocation17]  }
  0x16   : > { %p2204_p3 = pnand %p1467_p0, %p266_p2  ;;  %s300_s18 = sshll.u32 %s2111_s17, 4  ;;  %s2211_s18 = int_to_ptr.vmem [resolvable:$true] %s300_s18 }
  0x17   : > { %s326_s21 = sshll.u32 %s2112_s20, 4  ;;  %s2682_s3 = sld [smem:[#allocation33_spill]]  ;;  %s2219_s21 = int_to_ptr.vmem [resolvable:$true] %s326_s21 }
  0x18   : > { %s2680_s16 = scalar_select %p2204_p3, 1, 0 }
  0x19   : > { %p1663_p5 = pneg %p2204_p3 }
  0x1b   : > { %p2215_p6 = pnand %p1663_p5, %p2658_p1 }
  0x1d   : > { %s2681_s19 = scalar_select %p2215_p6, 1, 0 }
  0x1e   : > { %s1768_s24 = scalar_lea.hbm %s2682_s3, 16  ;;  %p2229_p8 = pneg %p2215_p6 }
  0x1f   : > { %p1769_p7 = scmp.ne.s32.totalorder %s2682_s3, %s1768_s24  ;;  %p1775_p11 = scmp.lt.u32.totalorder %s1768_s24, %s2682_s3 }
  0x20   : > { %s2683_s27 = scalar_select %p2229_p8, 1, 0 }
  0x21   : > { %p1771_p9 = pnand %p2229_p8, %p1769_p7 }
  0x23   : > { %p1772_p10 = pneg %p1771_p9 }
  0x25   : > { %p1777_p12 = pnand %p1775_p11, %p1772_p10 }
  0x27   : > { %1780 = shalt.err (!%p1777_p12)
}
  0x28   : > { %s1781_s13 = scalar_lea.vmem %s2202_s14, 16  ;;  %s1788_s17 = scalar_lea.vmem %s2202_s14, 32 }
  0x29   : > { %p1782_p13 = scmp.ne.s32.totalorder %s2202_s14, %s1781_s13  ;;  %p1789_p5 = scmp.lt.s32.totalorder %s2202_s14, %s2202_s14 }
  0x2a   : > { %p1790_p7 = scmp.lt.s32.totalorder %s1788_s17, %s1781_s13 }
  0x2b   : > { %p1784_p0 = pnand %p1782_p13, %p2229_p8 }
  0x2c   : > { %p1791_p9 = por %p1790_p7, %p1789_p5 }
  0x2d   : > { %p1785_p2 = pneg %p1784_p0 }
  0x2f   : > { %p1792_p4 = pnand %p1791_p9, %p1785_p2 }
  0x31   : > { %1795 = shalt.err (!%p1792_p4)
}
  0x32   : > { %1666 = dma.hbm_to_vmem [thread:$0]  (!%p2215_p6), %s2682_s3, 16, %s2202_s14, [#allocation12]  }
  0x33   : > { %s2684_s5 = sld [smem:[#allocation35_spill]] }
  0x39   : > { %s1796_s25 = scalar_lea.hbm %s2684_s5, 512 }
  0x3a   : > { %p1797_p10 = scmp.ne.s32.totalorder %s2684_s5, %s1796_s25  ;;  %p1803_p4 = scmp.lt.u32.totalorder %s1796_s25, %s2684_s5 }
  0x3c   : > { %p1799_p11 = pnand %p1797_p10, %p2229_p8 }
  0x3e   : > { %p1800_p12 = pneg %p1799_p11 }
  0x40   : > { %p1805_p13 = pnand %p1803_p4, %p1800_p12 }
  0x42   : > { %1808 = shalt.err (!%p1805_p13)
}
  0x43   : > { %s1809_s14 = scalar_lea.vmem %s2211_s18, 512  ;;  %p1817_p7 = scmp.lt.s32.totalorder %s2211_s18, %s2211_s18 }
  0x44   : > { %p1810_p0 = scmp.ne.s32.totalorder %s2211_s18, %s1809_s14  ;;  %p1818_p9 = scmp.lt.s32.totalorder %s1809_s14, %s1809_s14 }
  0x46   : > { %p1812_p2 = pnand %p1810_p0, %p2229_p8  ;;  %p1819_p10 = por %p1818_p9, %p1817_p7 }
  0x48   : > { %p1813_p5 = pneg %p1812_p2 }
  0x4a   : > { %p1820_p11 = pnand %p1819_p10, %p1813_p5 }
  0x4c   : > { %1823 = shalt.err (!%p1820_p11)
}
  0x4d   : > { %s2650_s17 = smov 128   ;;  %s2652_s20 = smov 8  }
  0x4e   : > { %1672 = dma.hbm_to_vmem [thread:$0]  (!%p2215_p6), %s2684_s5, 512, %s2211_s18, [#allocation15], %s2650_s17, %s2650_s17, %s2652_s20  }
  0x4f   : > { %s2685_s7 = sld [smem:[#allocation36_spill]] }
  0x55   : > { %s1824_s26 = scalar_lea.hbm %s2685_s7, 512 }
  0x56   : > { %p1825_p12 = scmp.ne.s32.totalorder %s2685_s7, %s1824_s26  ;;  %p1831_p0 = scmp.lt.u32.totalorder %s1824_s26, %s2685_s7 }
  0x58   : > { %p1827_p4 = pnand %p1825_p12, %p2229_p8 }
  0x5a   : > { %p1828_p13 = pneg %p1827_p4 }
  0x5c   : > { %p1833_p2 = pnand %p1831_p0, %p1828_p13 }
  0x5e   : > { %1836 = shalt.err (!%p1833_p2)
}
  0x5f   : > { %s1837_s18 = scalar_lea.vmem %s2219_s21, 512  ;;  %p1845_p10 = scmp.lt.s32.totalorder %s2219_s21, %s2219_s21 }
  0x60   : > { %p1838_p5 = scmp.ne.s32.totalorder %s2219_s21, %s1837_s18  ;;  %p1846_p11 = scmp.lt.s32.totalorder %s1837_s18, %s1837_s18 }
  0x62   : > { %p1840_p7 = pnand %p1838_p5, %p2229_p8  ;;  %p1847_p12 = por %p1846_p11, %p1845_p10 }
  0x64   : > { %p1841_p9 = pneg %p1840_p7 }
  0x66   : > { %p1848_p4 = pnand %p1847_p12, %p1841_p9 }
  0x68   : > { %1851 = shalt.err (!%p1848_p4)
}
  0x69   : > { %1678 = dma.hbm_to_vmem [thread:$0]  (!%p2215_p6), %s2685_s7, 512, %s2219_s21, [#allocation18], %s2650_s17, %s2650_s17, %s2652_s20  }
  0x6a   : > { %s1466_s24 = sadd.s32 4294967294, %s2108_s12   ;;  %s2305_s25 = sadd.s32 1, %s2108_s12  }
  0x6b   : > { %2686 = sst [smem:[#allocation29_spill]] %s2305_s25  ;;  %s38_s26 = sadd.s32 1, %s2104_s11 }
  0x6c   : > { %s35_s28 = ssub.s32 %s2108_s12, %s2305_s25  ;;  %p45_p13 = scmp.ne.s32.totalorder %s2104_s11, %s2100_s10 }
  0x6d   : > { %p36_p0 = scmp.eq.s32.totalorder %s35_s28, 0  ;;  %p46_p2 = scmp.eq.s32.totalorder %s2108_s12, 0 }
  0x6e   : > { %p51_p5 = scmp.ne.s32.totalorder %s2100_s10, %s2096_s30  ;;  %p253_p7 = scmp.eq.s32.totalorder %s2197_s15, 1 }
  0x6f   : > { %s2317_s29 = scalar_select %p36_p0, %s2104_s11, %s38_s26  }
  0x70   : > { %p47_p9 = por %p46_p2, %p45_p13  ;;  %p2321_p10 = por %p2658_p1, %p51_p5 }
  0x71   : > { %2687 = sst [smem:[#allocation30_spill]] %s2317_s29  ;;  %p2325_p11 = por %p253_p7, %p45_p13 }
  0x72   : > { %s2688_s21 = scalar_select %p2321_p10, 1, 0 }
  0x73   : > { %s2689_s13 = scalar_select %p2325_p11, 1, 0 }
  0x74   : > { %p259_p12 = scmp.eq.s32.totalorder %s1466_s24, 1  ;;  %p1702_p4 = scmp.lt.s32.totalorder %s2108_s12, 2 }
  0x75   : > { %s2654_s14 = sand.u32 1, %s2104_s11   ;;  %s2340_s23 = sshll.u32 %s2108_s12, 7 }
  0x76   : > { %p2331_p3 = por %p259_p12, %p51_p5  ;;  %s2337_s22 = sshll.u32 %s2654_s14, 3 }
  0x77   : > { %p2342_p0 = pnand %p1702_p4, %p47_p9  ;;  %s371_s28 = sand.u32 1, %s2108_s12  }
  0x78   : > { %s2690_s18 = scalar_select %p2331_p3, 1, 0 }
  0x79   : > { %s2692_s26 = scalar_select %p2342_p0, 1, 0 }
  0x7a   : > { %2691 = sst [smem:[#allocation31_spill]] %s2690_s18  ;;  %s2693_s1 = sld [smem:[#allocation32_spill]] }
  0x7b   : > { %s375_s14 = scalar_lea.vmem [#allocation8], %s2337_s22  ;;  %s2356_s5 = scalar_lea.sflag [#allocation9], %s371_s28 }
  0x7c   : > { %s382_s3 = sshll.u32 %s375_s14, 4  ;;  %p2362_p2 = pneg %p2342_p0  ;;  %s2354_s3 = int_to_ptr.vmem [resolvable:$true] %s382_s3 }
  0x7e   : > { %s2694_s29 = scalar_select %p2362_p2, 1, 0 }
  0x80   : > { %s2351_s20 = scalar_lea.hbm %s2693_s1, %s2340_s23  ;;  %s1857_s25 = scalar_lea.hbm %s2693_s1, 256 }
  0x81   : > { %s1852_s7 = scalar_lea.hbm %s2351_s20, 128  ;;  %p1858_p9 = scmp.lt.u32.totalorder %s2351_s20, %s2693_s1 }
  0x82   : > { %p1853_p13 = scmp.ne.s32.totalorder %s2351_s20, %s1852_s7  ;;  %p1859_p12 = scmp.lt.u32.totalorder %s1857_s25, %s1852_s7 }
  0x83   : > { %p1861_p1 = scmp.lt.u32.totalorder %s1852_s7, %s2351_s20 }
  0x84   : > { %p1855_p5 = pnand %p2362_p2, %p1853_p13  ;;  %p1860_p4 = por %p1859_p12, %p1858_p9 }
  0x86   : > { %p1856_p7 = pneg %p1855_p5  ;;  %p1862_p3 = por %p1861_p1, %p1860_p4 }
  0x88   : > { %p1863_p11 = pnand %p1862_p3, %p1856_p7 }
  0x8a   : > { %1866 = shalt.err (!%p1863_p11)
}
  0x8b   : > { %s1867_s28 = scalar_lea.vmem %s2354_s3, 128  ;;  %s2115_s17 = smov [#allocation8]  }
  0x8c   : > { %p1868_p13 = scmp.ne.s32.totalorder %s2354_s3, %s1867_s28  ;;  %s1872_s24 = sshll.u32 %s2115_s17, 4  ;;  %s1873_s24 = int_to_ptr.vmem [resolvable:$false] %s1872_s24 }
  0x8d   : > { %s1874_s12 = scalar_lea.vmem %s1873_s24, 256  ;;  %p1875_p6 = scmp.lt.s32.totalorder %s2354_s3, %s1873_s24 }
  0x8e   : > { %p1870_p5 = pnand %p1868_p13, %p2362_p2  ;;  %p1876_p8 = scmp.lt.s32.totalorder %s1874_s12, %s1867_s28 }
  0x90   : > { %p1871_p10 = pneg %p1870_p5  ;;  %p1877_p9 = por %p1876_p8, %p1875_p6 }
  0x92   : > { %p1878_p12 = pnand %p1877_p9, %p1871_p10 }
  0x94   : > { %1881 = shalt.err (!%p1878_p12)
}
  0x95   : > { %1688 = dma.hbm_to_vmem [thread:$0]  (!%p2342_p0), %s2351_s20, 128, %s2354_s3, %s2356_s5  }
  0x96   : > { %s2116_s7 = smov [#allocation13]   ;;  %s2117_s14 = smov [#allocation16]  }
  0x97   : > { %s290_s25 = sshll.u32 %s2116_s7, 4  ;;  %s313_s1 = sshll.u32 %s2117_s14, 4  ;;  %s291_s25 = int_to_ptr.vmem [resolvable:$true] %s290_s25  ;;  %s314_s1 = int_to_ptr.vmem [resolvable:$true] %s313_s1 }
  0x98   : > { %s2695_s4 = sld [smem:[#allocation34_spill]]  ;;  %p2696_p3 = scmp.ne.s32.totalorder %s2683_s27, 0 }
  0x9e   : > { %s1882_s24 = scalar_lea.hbm %s2695_s4, 16 }
  0x9f   : > { %p1883_p1 = scmp.ne.s32.totalorder %s2695_s4, %s1882_s24  ;;  %p1889_p10 = scmp.lt.u32.totalorder %s1882_s24, %s2695_s4 }
  0xa1   : > { %p1885_p6 = pnand %p1883_p1, %p2696_p3 }
  0xa3   : > { %p1886_p8 = pneg %p1885_p6 }
  0xa5   : > { %p1891_p11 = pnand %p1889_p10, %p1886_p8 }
  0xa7   : > { %1894 = shalt.err (!%p1891_p11)
}
  0xa8   : > { %s1895_s3 = scalar_lea.vmem %s291_s25, 16  ;;  %s1902_s20 = scalar_lea.vmem %s291_s25, 32 }
  0xa9   : > { %p1896_p7 = scmp.ne.s32.totalorder %s291_s25, %s1895_s3  ;;  %p1903_p5 = scmp.lt.s32.totalorder %s291_s25, %s291_s25 }
  0xaa   : > { %p1904_p9 = scmp.lt.s32.totalorder %s1902_s20, %s1895_s3 }
  0xab   : > { %p1898_p4 = pnand %p1896_p7, %p2696_p3 }
  0xac   : > { %p1905_p12 = por %p1904_p9, %p1903_p5 }
  0xad   : > { %p1899_p13 = pneg %p1898_p4 }
  0xaf   : > { %p1906_p0 = pnand %p1905_p12, %p1899_p13 }
  0xb1   : > { %1909 = shalt.err (!%p1906_p0)
}
  0xb2   : > { %p2697_p1 = scmp.ne.s32.totalorder %s2681_s19, 0  ;;  %s1910_s14 = scalar_lea.hbm %s2645_s6, 512 }
  0xb3   : > { %p1911_p6 = scmp.ne.s32.totalorder %s2645_s6, %s1910_s14  ;;  %p1917_p0 = scmp.lt.u32.totalorder %s1910_s14, %s2645_s6 }
  0xb4   : > { %1669 = dma.hbm_to_vmem [thread:$0]  (!%p2697_p1), %s2695_s4, 16, %s291_s25, [#allocation12]  }
  0xb5   : > { %p1913_p8 = pnand %p1911_p6, %p2696_p3 }
  0xb7   : > { %p1914_p10 = pneg %p1913_p8 }
  0xb9   : > { %p1919_p11 = pnand %p1917_p0, %p1914_p10 }
  0xbb   : > { %1922 = shalt.err (!%p1919_p11)
}
  0xbc   : > { %s1923_s3 = scalar_lea.vmem %s314_s1, 512  ;;  %p1931_p5 = scmp.lt.s32.totalorder %s314_s1, %s314_s1 }
  0xbd   : > { %p1924_p7 = scmp.ne.s32.totalorder %s314_s1, %s1923_s3  ;;  %p1932_p9 = scmp.lt.s32.totalorder %s1923_s3, %s1923_s3 }
  0xbf   : > { %p1926_p4 = pnand %p1924_p7, %p2696_p3  ;;  %p1933_p12 = por %p1932_p9, %p1931_p5 }
  0xc1   : > { %p1927_p13 = pneg %p1926_p4 }
  0xc3   : > { %p1934_p2 = pnand %p1933_p12, %p1927_p13 }
  0xc5   : > { %1937 = shalt.err (!%p1934_p2)
}
  0xc6   : > { %s2698_s25 = smov 8   ;;  %s2699_s20 = smov 128  }
  0xc7   : > { %1675 = dma.hbm_to_vmem [thread:$0]  (!%p2697_p1), %s2645_s6, 512, %s314_s1, [#allocation15], %s2699_s20, %s2699_s20, %s2698_s25  }
  0xc8   : > { %s2118_s9 = smov [#allocation19]   ;;  %s1938_s24 = scalar_lea.hbm %s2647_s8, 512 }
  0xc9   : > { %s339_s30 = sshll.u32 %s2118_s9, 4  ;;  %p1939_p2 = scmp.ne.s32.totalorder %s2647_s8, %s1938_s24  ;;  %s340_s30 = int_to_ptr.vmem [resolvable:$true] %s339_s30 }
  0xca   : > { %p1945_p10 = scmp.lt.u32.totalorder %s1938_s24, %s2647_s8 }
  0xcb   : > { %p1941_p6 = pnand %p1939_p2, %p2696_p3 }
  0xcd   : > { %p1942_p8 = pneg %p1941_p6 }
  0xcf   : > { %p1947_p0 = pnand %p1945_p10, %p1942_p8 }
  0xd1   : > { %1950 = shalt.err (!%p1947_p0)
}
  0xd2   : > { %s1951_s1 = scalar_lea.vmem %s340_s30, 512  ;;  %p1959_p13 = scmp.lt.s32.totalorder %s340_s30, %s340_s30 }
  0xd3   : > { %p1952_p11 = scmp.ne.s32.totalorder %s340_s30, %s1951_s1  ;;  %p1960_p5 = scmp.lt.s32.totalorder %s1951_s1, %s1951_s1 }
  0xd5   : > { %p1954_p7 = pnand %p1952_p11, %p2696_p3  ;;  %p1961_p9 = por %p1960_p5, %p1959_p13 }
  0xd7   : > { %p1955_p4 = pneg %p1954_p7 }
  0xd9   : > { %p1962_p12 = pnand %p1961_p9, %p1955_p4 }
  0xdb   : > { %1965 = shalt.err (!%p1962_p12)
}
  0xdc   : > { %1681 = dma.hbm_to_vmem [thread:$0]  (!%p2697_p1), %s2647_s8, 512, %s340_s30, [#allocation18], %s2699_s20, %s2699_s20, %s2698_s25  }
  0xdd   : > { %s2450_s9 = scalar_lea.hbm %s2639_s0, %s2340_s23  ;;  %s357_s19 = scalar_lea.vmem [#allocation5], %s2337_s22 }
  0xde   : > { %s364_s14 = sshll.u32 %s357_s19, 4  ;;  %s2700_s17 = sand.u32 1, %s2104_s11   ;;  %s365_s14 = int_to_ptr.vmem [resolvable:$true] %s364_s14 }
  0xdf   : > { %s354_s24 = scalar_lea.sflag [#allocation6], %s2700_s17  ;;  %s1966_s28 = scalar_lea.hbm %s2450_s9, 128 }
  0xe0   : > { %p1967_p3 = scmp.ne.s32.totalorder %s2450_s9, %s1966_s28  ;;  %p2701_p2 = scmp.ne.s32.totalorder %s2694_s29, 0 }
  0xe1   : > { %s1971_s30 = scalar_lea.hbm %s2639_s0, 256  ;;  %p1972_p1 = scmp.lt.u32.totalorder %s2450_s9, %s2639_s0 }
  0xe2   : > { %p1969_p6 = pnand %p1967_p3, %p2701_p2  ;;  %p1973_p10 = scmp.lt.u32.totalorder %s1971_s30, %s1966_s28 }
  0xe3   : > { %p1975_p11 = scmp.lt.u32.totalorder %s1966_s28, %s2450_s9 }
  0xe4   : > { %p1970_p8 = pneg %p1969_p6  ;;  %p1974_p0 = por %p1973_p10, %p1972_p1 }
  0xe6   : > { %p1976_p7 = por %p1975_p11, %p1974_p0 }
  0xe8   : > { %p1977_p4 = pnand %p1976_p7, %p1970_p8 }
  0xea   : > { %1980 = shalt.err (!%p1977_p4)
}
  0xeb   : > { %s1981_s1 = scalar_lea.vmem %s365_s14, 128  ;;  %s2119_s4 = smov [#allocation5]  }
  0xec   : > { %p1982_p13 = scmp.ne.s32.totalorder %s365_s14, %s1981_s1  ;;  %s1986_s18 = sshll.u32 %s2119_s4, 4  ;;  %s1987_s18 = int_to_ptr.vmem [resolvable:$false] %s1986_s18 }
  0xed   : > { %s1988_s27 = scalar_lea.vmem %s1987_s18, 256  ;;  %p1989_p12 = scmp.lt.s32.totalorder %s365_s14, %s1987_s18 }
  0xee   : > { %p1984_p5 = pnand %p1982_p13, %p2701_p2  ;;  %p1990_p3 = scmp.lt.s32.totalorder %s1988_s27, %s1981_s1 }
  0xf0   : > { %p1985_p9 = pneg %p1984_p5  ;;  %p1991_p6 = por %p1990_p3, %p1989_p12 }
  0xf2   : > { %p1992_p1 = pnand %p1991_p6, %p1985_p9 }
  0xf4   : > { %1995 = shalt.err (!%p1992_p1)
}
  0xf5   : > { %p2702_p10 = scmp.ne.s32.totalorder %s2692_s26, 0  ;;  %s2476_s17 = scalar_lea.hbm %s2641_s2, %s2340_s23 }
  0xf6   : > { %s393_s28 = scalar_lea.vmem [#allocation10], %s2337_s22  ;;  %s1996_s20 = scalar_lea.hbm %s2476_s17, 128 }
  0xf7   : > { %1685 = dma.hbm_to_vmem [thread:$0]  (!%p2702_p10), %s2450_s9, 128, %s365_s14, %s354_s24  }
  0xf8   : > { %s400_s25 = sshll.u32 %s393_s28, 4  ;;  %p1997_p8 = scmp.ne.s32.totalorder %s2476_s17, %s1996_s20  ;;  %s401_s25 = int_to_ptr.vmem [resolvable:$true] %s400_s25 }
  0xf9   : > { %s2001_s9 = scalar_lea.hbm %s2641_s2, 256  ;;  %p2002_p7 = scmp.lt.u32.totalorder %s2476_s17, %s2641_s2 }
  0xfa   : > { %p1999_p0 = pnand %p1997_p8, %p2701_p2  ;;  %p2003_p4 = scmp.lt.u32.totalorder %s2001_s9, %s1996_s20 }
  0xfb   : > { %p2005_p5 = scmp.lt.u32.totalorder %s1996_s20, %s2476_s17 }
  0xfc   : > { %p2000_p11 = pneg %p1999_p0  ;;  %p2004_p13 = por %p2003_p4, %p2002_p7 }
  0xfe   : > { %p2006_p9 = por %p2005_p5, %p2004_p13 }
 0x100   : > { %p2007_p12 = pnand %p2006_p9, %p2000_p11 }
 0x102   : > { %2010 = shalt.err (!%p2007_p12)
}
 0x103   : > { %s2011_s22 = scalar_lea.vmem %s401_s25, 128  ;;  %s2120_s23 = smov [#allocation10]  }
 0x104   : > { %p2012_p3 = scmp.ne.s32.totalorder %s401_s25, %s2011_s22  ;;  %s2016_s3 = sshll.u32 %s2120_s23, 4  ;;  %s2017_s3 = int_to_ptr.vmem [resolvable:$false] %s2016_s3 }
 0x105   : > { %s2018_s1 = scalar_lea.vmem %s2017_s3, 256  ;;  %p2019_p8 = scmp.lt.s32.totalorder %s401_s25, %s2017_s3 }
 0x106   : > { %p2014_p6 = pnand %p2012_p3, %p2701_p2  ;;  %p2020_p0 = scmp.lt.s32.totalorder %s2018_s1, %s2011_s22 }
 0x108   : > { %p2015_p1 = pneg %p2014_p6  ;;  %p2021_p10 = por %p2020_p0, %p2019_p8 }
 0x10a   : > { %p2022_p4 = pnand %p2021_p10, %p2015_p1 }
 0x10c   : > { %2025 = shalt.err (!%p2022_p4)
}
 0x10d   : > { %p2703_p7 = scmp.ne.s32.totalorder %s2692_s26, 0  ;;  %p2704_p11 = scmp.ne.s32.totalorder %s2680_s16, 0 }
 0x10e   : > { %s2500_s29 = sand.u32 (!%p2704_p11), 1, %s2100_s10   ;;  %p2705_p2 = scmp.ne.s32.totalorder (!%p2704_p11), %s2688_s21, 0 }
 0x10f   : > { %1691 = dma.hbm_to_vmem [thread:$0]  (!%p2703_p7), %s2476_s17, 128, %s401_s25, %s2356_s5  }
 0x110   : > { %409 = sbr.rel (%p2704_p11) target bundleno = 2332 (0x91c), region = 56  ;;  %s2503_s4 = sshll.u32 (!%p2704_p11), %s2500_s29, 3 }
 0x111   : > { %s412_s18 = scalar_lea.sflag (!%p2704_p11), [#allocation6], %s2500_s29  ;;  %s415_s27 = scalar_lea.vmem (!%p2704_p11), [#allocation5], %s2503_s4 }
 0x117   : > { %2071 = dma.done.wait (%p2705_p2), %s412_s18, 128  }
 0x118   : > { %2073 = vsyncadd (%p2705_p2), %s412_s18, 4294967168  ;;  %s420_s5 = sand.u32 1, %s2197_s15   ;;  %s424_s26 = scalar_lea.vmem [#allocation8], %s2503_s4 }
 0x119   : > { %s421_s16 = scalar_lea.sflag [#allocation9], %s420_s5 }
 0x11a   : > { %2075 = dma.done.wait (%p2705_p2), %s421_s16, 256  }
 0x11b   : > { %2077 = vsyncadd (%p2705_p2), %s421_s16, 4294967040  ;;  %s433_s7 = scalar_lea.vmem [#allocation10], %s2503_s4  ;;  %p2706_p10 = scmp.eq.s32.totalorder %s2197_s15, 0 }
 0x11d   : > { %2079 = dma.done.wait (%p2706_p10), [#allocation12], 32   ;;  %p2707_p13 = pmov %p2706_p10 }
 0x11e   : > { %p2708_p5 = pmov %p2706_p10 }
 0x11f   : > { %2081 = vsyncadd (%p2707_p13), [#allocation12], 4294967264 }
 0x120   : > { %2083 = dma.done.wait (%p2708_p5), [#allocation15], 1024   ;;  %p2709_p9 = pmov %p2708_p5 }
 0x121   : > { %p2710_p12 = pmov %p2708_p5 }
 0x122   : > { %2085 = vsyncadd (%p2709_p9), [#allocation15], 4294966272 }
 0x123   : > { %2087 = dma.done.wait (%p2710_p12), [#allocation18], 1024   ;;  %p2711_p3 = pmov %p2708_p5 }
 0x124   : > { %vm505_vm0 = vcmask 261120   ;;  %v534_v0 = vld [vmem:[%s424_s26] sm:$0xff]  ;;  %v504_v1 = vld [vmem:[%s415_s27] sm:$0xff]  ;;  %v2121_v17 = vmov 0.0|0.0   ;;  %vm2122_vm1 = vmmov 0   ;;  %v2123_v23 = vmov 0.0  }
 0x125   : > { %2089 = vsyncadd (%p2711_p3), [#allocation18], 4294966272  ;;  %v535_v2 = vsel %vm505_vm0, %v534_v0, 0.0  ;;  %v506_v3 = vsel %vm505_vm0, %v504_v1, 0.0  ;;  %v644_v14 = vld [vmem:[#allocation16] sm:$0xff]  ;;  %v645_v15 = vld [vmem:[#allocation16 + $0x8] sm:$0xff]  ;;  %1611 = vmatprep.subr.bf16.mxu1 %v2121_v17  ;;  %1605 = vmatprep.subr.bf16.mxu0 %v2121_v17 }
 0x126   : > { %536 = vadd.xlane.f32.xlu0 %v535_v2  ;;  %v566_v16 = vld [vmem:[#allocation14] sm:$0xff]  ;;  %v1612_v18 = vpack.c.bf16 %v645_v15, %v644_v14  ;;  %v567_v19 = vld [vmem:[#allocation14 + $0x8] sm:$0xff]  ;;  %v646_v20 = vld [vmem:[#allocation16 + $0x10] sm:$0xff]  ;;  %1557 = vmatprep.mubr.msk.f32.mxu1 %vm2122_vm1, %v2123_v23  ;;  %vm807_vm2 = vcmask 130048   ;;  %vm884_vm3 = vcmask 64512   ;;  %s2124_s21 = smov 112  }
 0x127   : > { %v647_v21 = vld [vmem:[#allocation16 + $0x18] sm:$0xff]  ;;  %v1606_v22 = vpack.c.bf16 %v567_v19, %v566_v16  ;;  %1546 = vmatprep.mubr.msk.f32.mxu0 %vm2122_vm1, %v2123_v23  ;;  %v568_v25 = vld [vmem:[#allocation14 + $0x10] sm:$0xff]  ;;  %v722_v51 = vld [vmem:[#allocation17] sm:$0xff]  ;;  %s1506_s19 = sshll.u32 %s2197_s15, 7  ;;  %s501_s17 = scalar_lea.vmem [#allocation20], %s2503_s4 }
 0x128   : > { %1613 = vmatpush3.bf16.msra.mxu1 %v1612_v18  ;;  %v1615_v24 = vpack.c.bf16 %v647_v21, %v646_v20  ;;  %v569_v26 = vld [vmem:[#allocation14 + $0x18] sm:$0xff]  ;;  %v723_v52 = vld [vmem:[#allocation17 + $0x8] sm:$0xff]  ;;  %v724_v53 = vld [vmem:[#allocation17 + $0x10] sm:$0xff]  ;;  %s1296_s28 = sshll.u32 %s501_s17, 4  ;;  %s2712_s30 = sld [smem:[#allocation37_spill]]  ;;  %s2596_s28 = int_to_ptr.vmem [resolvable:$true] %s1296_s28 }
 0x129   : > { %1614 = vmatprep.subr.bf16.mxu1 %v2121_v17  ;;  %1607 = vmatpush3.bf16.msra.mxu0 %v1606_v22  ;;  %v1609_v27 = vpack.c.bf16 %v569_v26, %v568_v25  ;;  %v550_v28 = vld [vmem:[%s433_s7] sm:$0xff]  ;;  %v1492_v37 = vld [vmem:[#allocation11] ss:$0 sm:$0xff]  ;;  %v1493_v39 = vld [vmem:[#allocation13] ss:$0 sm:$0xff]  ;;  %v1618_v54 = vpack.c.bf16 %v723_v52, %v722_v51  ;;  %s1283_s14 = scalar_lea.sflag [#allocation7], %s2500_s29 }
 0x12a   : > { %507 = vadd.xlane.f32.xlu0 %v506_v3  ;;  %1608 = vmatprep.subr.bf16.mxu0 %v2121_v17  ;;  %v551_v29 = vsel %vm505_vm0, %v550_v28, 0.0  ;;  %v725_v55 = vld [vmem:[#allocation17 + $0x18] sm:$0xff]  ;;  %s2026_s24 = scalar_lea.vmem %s2596_s28, 128  ;;  %p2714_p1 = scmp.ne.s32.totalorder %s2689_s13, 0 }
 0x12b   : > { %v1621_v56 = vpack.c.bf16 %v725_v55, %v724_v53  ;;  %p2027_p6 = scmp.ne.s32.totalorder %s2596_s28, %s2026_s24  ;;  %s2125_s15 = smov [#allocation20]  }
 0x12c   : > { %1616 = vmatpush3.bf16.msra.mxu1 %v1615_v24  ;;  %s2030_s22 = sshll.u32 %s2125_s15, 4  ;;  %s2031_s22 = int_to_ptr.vmem [resolvable:$false] %s2030_s22 }
 0x12d   : > { %1571 = vmatprep.subr.mxu1 %v2123_v23  ;;  %1610 = vmatpush3.bf16.msra.mxu0 %v1609_v27  ;;  %p2028_p8 = pnand %p2027_p6, %p2714_p1  ;;  %s2032_s23 = scalar_lea.vmem %s2031_s22, 256 }
 0x12e   : > { %1617 = vmatprep.subr.bf16.mxu0 %v2121_v17  ;;  %552 = vadd.xlane.f32.xlu0 %v551_v29  ;;  %s2713_s9 = smov %s2712_s30  ;;  %s2594_s12 = scalar_lea.hbm %s2712_s30, %s1506_s19 }
 0x12f   : > { %p2029_p0 = pneg %p2028_p8  ;;  %p2033_p4 = scmp.lt.s32.totalorder %s2596_s28, %s2031_s22 }
 0x130   : > { %p2034_p7 = scmp.lt.s32.totalorder %s2032_s23, %s2026_s24 }
 0x132   : > { %p2035_p11 = por %p2034_p7, %p2033_p4 }
 0x134   : > { %p2036_p2 = pnand %p2035_p11, %p2029_p0 }
 0x1b3   : > { %v537_v4 = vpop.xlane.xlu0 %536 }
 0x1b4   : > { %v538_v5 = vmul.f32 0.03125, %v537_v4 }
 0x1b6   : > { %v539_v6 = vsub.f32 %v534_v0, %v538_v5 }
 0x1b7   : > { %v508_v7 = vpop.xlane.xlu0 %507 }
 0x1b8   : > { %v510_v8 = vmul.f32 0.03125, %v508_v7  ;;  %v540_v9 = vmul.f32 %v539_v6, %v539_v6 }
 0x1ba   : > { %v511_v10 = vsub.f32 %v504_v1, %v510_v8  ;;  %v541_v11 = vsel %vm505_vm0, %v540_v9, 0.0 }
 0x1bb   : > { %542 = vadd.xlane.f32.xlu1 %v541_v11  ;;  %v553_v46 = vpop.xlane.xlu0 %552 }
 0x1bc   : > { %v512_v12 = vmul.f32 %v511_v10, %v511_v10  ;;  %v554_v47 = vmul.f32 0.03125, %v553_v46 }
 0x1be   : > { %v513_v13 = vsel %vm505_vm0, %v512_v12, 0.0  ;;  %v555_v48 = vsub.f32 %v550_v28, %v554_v47 }
 0x1bf   : > { %514 = vadd.xlane.f32.xlu1 %v513_v13 }
 0x1c0   : > { %v556_v49 = vmul.f32 %v555_v48, %v555_v48 }
 0x1c2   : > { %v557_v50 = vsel %vm505_vm0, %v556_v49, 0.0 }
 0x1c3   : > { %558 = vadd.xlane.f32.xlu1 %v557_v50 }
 0x248   : > { %v543_v30 = vpop.xlane.xlu1 %542 }
 0x249   : > { %v544_v31 = vmul.f32 0.03125, %v543_v30 }
 0x24b   : > { %v545_v32 = vadd.f32 1e-05, %v544_v31 }
 0x24c   : > { %v515_v33 = vpop.xlane.xlu1 %514 }
 0x24d   : > { %1754 = vrsqrt.f32 %v545_v32  ;;  %v516_v34 = vmul.f32 0.03125, %v515_v33 }
 0x24f   : > { %v517_v35 = vadd.f32 1e-05, %v516_v34  ;;  %v802_v34 = vld [vmem:[#allocation19 + $0x10] sm:$0xff] }
 0x250   : > { %v559_v57 = vpop.xlane.xlu1 %558 }
 0x251   : > { %1756 = vrsqrt.f32 %v517_v35  ;;  %v560_v58 = vmul.f32 0.03125, %v559_v57  ;;  %v803_v35 = vld [vmem:[#allocation19 + $0x18] sm:$0xff] }
 0x253   : > { %v561_v59 = vadd.f32 1e-05, %v560_v58 }
 0x255   : > { %1758 = vrsqrt.f32 %v561_v59 }
 0x257   : > { %v1755_v36 = vpop.eup %1754 }
 0x258   : > { %v547_v38 = vmul.f32 %v1755_v36, %v539_v6  ;;  %v1624_v36 = vpack.c.bf16 %v803_v35, %v802_v34 }
 0x25a   : > { %v548_v40 = vmul.f32 %v1492_v37, %v547_v38 }
 0x25b   : > { %v1757_v41 = vpop.eup %1756 }
 0x25c   : > { %v549_v42 = vadd.f32 %v1493_v39, %v548_v40  ;;  %v519_v43 = vmul.f32 %v1757_v41, %v511_v10  ;;  %v800_v41 = vld [vmem:[#allocation19] sm:$0xff] }
 0x25e   : > { %1558 = vmatmul.mubr.msk.f32.vlgmr.msra.gmra.mrb[0].mxu1 %vm505_vm0, %v549_v42  ;;  %v526_v44 = vmul.f32 %v1492_v37, %v519_v43  ;;  %v801_v42 = vld [vmem:[#allocation19 + $0x8] sm:$0xff] }
 0x25f   : > { %1573 = vmatprep.mubr.msk.f32.mxu1 %vm2122_vm1, %v2123_v23  ;;  %v1759_v60 = vpop.eup %1758  ;;  %v1627_v43 = vpack.c.bf16 %v801_v42, %v800_v41 }
 0x260   : > { %v533_v45 = vadd.f32 %v1493_v39, %v526_v44  ;;  %v563_v61 = vmul.f32 %v1759_v60, %v555_v48 }
 0x262   : > { %1547 = vmatmul.mubr.msk.f32.vlgmr.msra.gmra.mrb[0].mxu0 %vm505_vm0, %v533_v45  ;;  %v564_v62 = vmul.f32 %v1492_v37, %v563_v61 }
 0x263   : > { %1568 = vmatprep.mubr.msk.f32.mxu0 %vm2122_vm1, %v2123_v23  ;;  %1619 = vmatpush3.bf16.msra.mxu0 %v1618_v54 }
 0x264   : > { %1620 = vmatprep.subr.bf16.mxu0 %v2121_v17  ;;  %v565_v63 = vadd.f32 %v1493_v39, %v564_v62 }
 0x267   : > { %1622 = vmatpush3.bf16.msra.mxu0 %v1621_v56 }
 0x268   : > { %1623 = vmatprep.subr.bf16.mxu0 %v2121_v17 }
 0x26a   : > { %1569 = vmatmul.mubr.msk.f32.vlgmr.msra.gmra.mrb[2].mxu0 %vm505_vm0, %v565_v63 }
 0x26b   : > { %1595 = vmatprep.mubr.msk.f32.mxu0 %vm2122_vm1, %v2123_v23  ;;  %1625 = vmatpush3.bf16.msra.mxu0 %v1624_v36 }
 0x26c   : > { %1626 = vmatprep.subr.bf16.mxu0 %v2121_v17 }
 0x331   : > { %v717_v0 = vpop.f32.mrb[0].mxu1 }
 0x332   : > { %721 = vst.msk [vmem:[#allocation3] sm:$0xff] %vm505_vm0, %v717_v0  ;;  %v1559_v1 = vpop.f32.mrb[1].mxu1 }
 0x335   : > { %v639_v2 = vpop.f32.mrb[0].mxu0 }
 0x336   : > { %643 = vst.msk [vmem:[#allocation2] sm:$0xff] %vm505_vm0, %v639_v2  ;;  %v1548_v3 = vpop.f32.mrb[1].mxu0 }
 0x339   : > { %v805_v4 = vld [vmem:[#allocation3] sm:$0xff] }
 0x33a   : > { %1572 = vmatpush3.xpose.msk.msra.mxu1 %vm807_vm2, %v805_v4 }
 0x33b   : > { %1576 = vmatprep.subr.mxu1 %v2123_v23 }
 0x33d   : > { %v804_v5 = vld [vmem:[#allocation2] sm:$0xff]  ;;  %v795_v6 = vpop.f32.mrb[2].mxu0 }
 0x33e   : > { %1574 = vmatmul.mubr.msk.f32.vlgmr.msra.gmra.mrb[2].mxu1 %vm807_vm2, %v804_v5  ;;  %799 = vst.msk [vmem:[#allocation4] sm:$0xff] %vm505_vm0, %v795_v6  ;;  %v1570_v7 = vpop.f32.mrb[3].mxu0 }
 0x33f   : > { %1578 = vmatprep.mubr.msk.f32.mxu1 %vm2122_vm1, %v2123_v23 }
 0x345   : > { %v806_v11 = vld [vmem:[#allocation4] sm:$0xff] }
 0x346   : > { %1577 = vmatpush3.msra.mxu1 %v806_v11 }
 0x347   : > { %1581 = vmatprep.subr.mxu1 %v2123_v23 }
 0x411   : > { %v880_v8 = vpop.f32.mrb[2].mxu1 }
 0x412   : > { %v1575_v9 = vpop.f32.mrb[3].mxu1  ;;  %v885_v10 = vsel %vm884_vm3, %v880_v8, -inf }
 0x413   : > { %886 = vmax.xlane.f32.xlu0 %v885_v10 }
 0x429   : > { %971 = vrot.lane.b32.xlu0 %v805_v4, %s2124_s21 }
 0x4a0   : > { %v887_v12 = vpop.xlane.xlu0 %886 }
 0x4a1   : > { %v888_v13 = vsub.f32 %v880_v8, %v887_v12 }
 0x4a3   : > { %v889_v14 = vmul.f32 1.442695, %v888_v13 }
 0x4a4   : > { %v972_v21 = vpop.permute.xlu0 %971 }
 0x4a5   : > { %1760 = vpow2.f32 %v889_v14 }
 0x4af   : > { %v1761_v15 = vpop.eup %1760 }
 0x4b0   : > { %v891_v16 = vsel %vm884_vm3, %v1761_v15, 0.0 }
 0x4b1   : > { %892 = vadd.xlane.f32.xlu1 %v891_v16 }
 0x4c2   : > { %969 = vrot.lane.b32.xlu1 %v804_v5, %s2124_s21 }
 0x53e   : > { %v893_v18 = vpop.xlane.xlu1 %892 }
 0x53f   : > { %1762 = vrcp.f32 %v893_v18 }
 0x542   : > { %v970_v22 = vpop.permute.xlu1 %969 }
 0x549   : > { %v1763_v19 = vpop.eup %1762 }
 0x54a   : > { %v895_v20 = vmul.f32 %v1763_v19, %v1761_v15 }
 0x54c   : > { %1579 = vmatmul.mubr.msk.f32.vlgmr.msra.gmra.mrb[4].mxu1 %vm884_vm3, %v895_v20 }
 0x54d   : > { %1582 = vmatpush3.xpose.msk.msra.mxu1 %vm807_vm2, %v972_v21  ;;  %1583 = vmatprep.mubr.msk.f32.mxu1 %vm2122_vm1, %v2123_v23 }
 0x54e   : > { %1586 = vmatprep.subr.mxu1 %v2123_v23 }
 0x550   : > { %1584 = vmatmul.mubr.msk.f32.vlgmr.msra.gmra.mrb[6].mxu1 %vm807_vm2, %v970_v22 }
 0x551   : > { %1588 = vmatprep.mubr.msk.f32.mxu1 %vm2122_vm1, %v2123_v23 }
 0x61f   : > { %v965_v24 = vpop.f32.mrb[4].mxu1 }
 0x620   : > { %v1580_v25 = vpop.f32.mrb[5].mxu1 }
 0x623   : > { %v1043_v26 = vpop.f32.mrb[6].mxu1 }
 0x624   : > { %v1585_v27 = vpop.f32.mrb[7].mxu1  ;;  %v1047_v28 = vsel %vm884_vm3, %v1043_v26, -inf }
 0x625   : > { %1048 = vmax.xlane.f32.xlu1 %v1047_v28 }
 0x6b2   : > { %v1049_v29 = vpop.xlane.xlu1 %1048 }
 0x6b3   : > { %v1050_v30 = vsub.f32 %v1043_v26, %v1049_v29 }
 0x6b5   : > { %v1051_v31 = vmul.f32 1.442695, %v1050_v30 }
 0x6b7   : > { %1764 = vpow2.f32 %v1051_v31 }
 0x6c1   : > { %v1765_v32 = vpop.eup %1764 }
 0x6c2   : > { %v1053_v33 = vsel %vm884_vm3, %v1765_v32, 0.0 }
 0x6c3   : > { %1054 = vadd.xlane.f32.xlu0 %v1053_v33 }
 0x6d9   : > { %1059 = vrot.lane.b32.xlu0 %v806_v11, %s2124_s21 }
 0x750   : > { %v1055_v37 = vpop.xlane.xlu0 %1054 }
 0x751   : > { %1766 = vrcp.f32 %v1055_v37 }
 0x754   : > { %v1060_v38 = vpop.permute.xlu0 %1059 }
 0x755   : > { %1587 = vmatpush3.msra.mxu1 %v1060_v38 }
 0x75b   : > { %v1767_v39 = vpop.eup %1766 }
 0x75c   : > { %v1057_v40 = vmul.f32 %v1767_v39, %v1765_v32 }
 0x75e   : > { %1589 = vmatmul.mubr.msk.f32.vlgmr.msra.gmra.mrb[8].mxu1 %vm884_vm3, %v1057_v40 }
 0x831   : > { %v1131_v44 = vpop.f32.mrb[8].mxu1 }
 0x832   : > { %v1590_v45 = vpop.f32.mrb[9].mxu1  ;;  %1596 = vmatmul.mubr.msk.f32.vlgmr.msra.gmra.mrb[4].mxu0 %vm807_vm2, %v1131_v44 }
 0x833   : > { %1628 = vmatpush3.bf16.msra.mxu0 %v1627_v43  ;;  %1602 = vmatprep.mubr.msk.f32.mxu0 %vm2122_vm1, %v2123_v23 }
 0x83a   : > { %1603 = vmatmul.mubr.msk.f32.vlgmr.msra.gmra.mrb[4].mxu0 %vm807_vm2, %v965_v24 }
 0x90d   : > { %v1277_v17 = vpop.f32.mrb[4].mxu0 }
 0x90e   : > { %1281 = vst.msk [vmem:[%s501_s17] sm:$0xff] %vm505_vm0, %v1277_v17  ;;  %v1604_v46 = vpop.f32.mrb[5].mxu0 }
 0x90f   : > { %2039 = shalt.err (!%p2036_p2)
}
 0x910   : > { %s2040_s3 = scalar_lea.hbm %s2594_s12, 128  ;;  %s2044_s4 = scalar_lea.hbm %s2713_s9, 256 }
 0x911   : > { %p2041_p10 = scmp.ne.s32.totalorder %s2594_s12, %s2040_s3  ;;  %p2045_p9 = scmp.lt.u32.totalorder %s2594_s12, %s2713_s9 }
 0x912   : > { %p2046_p12 = scmp.lt.u32.totalorder %s2044_s4, %s2040_s3  ;;  %p2048_p6 = scmp.lt.u32.totalorder %s2040_s3, %s2594_s12 }
 0x913   : > { %p2042_p13 = pnand %p2041_p10, %p2714_p1 }
 0x914   : > { %p2047_p3 = por %p2046_p12, %p2045_p9 }
 0x915   : > { %p2043_p5 = pneg %p2042_p13 }
 0x916   : > { %p2049_p8 = por %p2048_p6, %p2047_p3 }
 0x918   : > { %p2050_p0 = pnand %p2049_p8, %p2043_p5 }
 0x91a   : > { %2053 = shalt.err (!%p2050_p0)
}
 0x91b   : > { %1661 = dma.vmem_to_hbm [thread:$0]  (%p2714_p1), %s2596_s28, 128, %s2594_s12, %s1283_s14  }
 0x91c PF: > { %s2715_s5 = sld [smem:[#allocation27_spill]]  ;;  %s2716_s16 = sld [smem:[#allocation31_spill]] }
 0x91d   : > { %s2717_s26 = sld [smem:[#allocation28_spill]] }
 0x922   : > { %s1308_s7 = sand.u32 1, %s2715_s5   ;;  %p2718_p4 = scmp.ne.s32.totalorder %s2716_s16, 0 }
 0x923   : > { %p2719_p7 = scmp.ge.s32.totalorder %s2717_s26, 2  ;;  %s1309_s21 = scalar_lea.sflag [#allocation7], %s1308_s7 }
 0x925   : > { %p1693_p11 = pnand %p2719_p7, %p2718_p4 }
 0x927   : > { %2091 = dma.done.wait (!%p1693_p11), %s1309_s21, 128  }
 0x928   : > { %2093 = vsyncadd (!%p1693_p11), %s1309_s21, 4294967168  ;;  %s2720_s12 = sld [smem:[#allocation29_spill]]  ;;  %s2721_s19 = sld [smem:[#allocation30_spill]] }
 0x929   : > { %s2722_s30 = smov %s2100_s10  ;;  %s2723_s10 = smov %s2104_s11 }
 0x92e   : > { %p28_p2 = scmp.ge.s32.totalorder %s2720_s12, 4   ;;  %s2724_s11 = smov %s2721_s19 }
 0x930   :  { %30 = sbr.rel (!%p28_p2) target bundleno = 17 (0x11), region = 149 }
 0x937   :  { %1314 = vsyncpa [#allocation6], 1 }
 0x938   :  { %1316 = vsyncpa [#allocation6 + $0x1], 1 }
 0x939   :  { %1317 = vsyncpa [#allocation9], 1 }
 0x93a   :  { %1319 = vsyncpa [#allocation9 + $0x1], 1 }
 0x93b   :  { %1320 = vsyncpa [#allocation12], 1 }
 0x93c   :  { %1321 = vsyncpa [#allocation15], 1 }
 0x93d   :  { %1322 = vsyncpa [#allocation18], 1 }
 0x93e   :  { %1323 = vsyncpa [#allocation7], 1 }
 0x93f   :  { %1325 = vsyncpa [#allocation7 + $0x1], 1 }

</bundles_post_ra>
